<compile_context>
chip_gen: v7x
topology: tpu7x:2x2x1
jax: 0.10.0
libtpu: 0.0.40
codegen_flags: <defaults>
</compile_context>

<pallas_src>
import functools

import jax
import jax.numpy as jnp
from jax import lax
from jax.experimental import pallas as pl
from jax.experimental.pallas import tpu as pltpu


def _round_up(v, m):
    return ((v + m - 1) // m) * m


def _pooler_kernel_fullk(x_ref, w_ref, b_ref, o_ref):
    """One (bm, bn) output tile; full-hidden contraction in a single grid step.

    x_ref: (bm, H)   first-token activations (M-resident across the N sweep)
    w_ref: (bn, H)   nn.Linear weight tile in its native [out, in] layout
    b_ref: (1, bn)   bias tile
    o_ref: (bm, bn)  lane-dense output tile
    """
    acc = lax.dot_general(
        x_ref[...], w_ref[...],
        dimension_numbers=(((1,), (1,)), ((), ())),   # x @ W.T without a transpose copy
        preferred_element_type=jnp.float32,
    )
    o_ref[...] = jnp.tanh(acc + b_ref[...].astype(jnp.float32)).astype(o_ref.dtype)


def _pooler_kernel_tiledk(x_ref, w_ref, b_ref, o_ref, acc_ref, *, bk):
    """Fallback for very large hidden: K-tiled matmul with f32 accumulator.

    x_ref is K-resident: (bm, Kp) fetched once per M tile; W streams (bn, bk).
    """
    k = pl.program_id(2)

    @pl.when(k == 0)
    def _init():
        acc_ref[...] = jnp.zeros_like(acc_ref)

    off = pl.multiple_of(k * bk, bk)
    acc_ref[...] += lax.dot_general(
        x_ref[:, pl.ds(off, bk)], w_ref[...],
        dimension_numbers=(((1,), (1,)), ((), ())),
        preferred_element_type=jnp.float32,
    )

    @pl.when(k == pl.num_programs(2) - 1)
    def _finalize():
        o_ref[...] = jnp.tanh(
            acc_ref[...] + b_ref[...].astype(jnp.float32)
        ).astype(o_ref.dtype)


_MAX_BM = 256              # cap on the M (batch) tile
_FULLK_MAX_HIDDEN = 2048   # collapse the K axis up to this hidden size


@jax.jit
def bert_pooler_forward(hidden_states, weight, bias):
    """tanh(hidden_states[:, 0] @ weight.T + bias)  — PyTorch BertPooler.

    hidden_states: [batch, seq, hidden]
    weight:        [hidden, hidden]   (nn.Linear layout: [out_features, in_features])
    bias:          [hidden]
    returns:       [batch, hidden]
    """
    batch, _, hidden = hidden_states.shape
    out_dtype = hidden_states.dtype

    # First-token select (cheap batch*hidden strided copy); W is NOT transposed
    # or padded in the common path, so it is streamed from HBM exactly once.
    # Callers that can tolerate it should pass bf16 weights: the kernel keeps an
    # f32 accumulation either way and halving W's bytes ~halves the kernel time.
    x = hidden_states[:, 0, :]              # [batch, hidden]
    b2 = bias.reshape(1, hidden)            # [1, hidden]

    # ---- M tiling: full batch when small (no pad), else 256-row tiles. ----
    if batch <= _MAX_BM:
        bm, mp = batch, batch
    else:
        bm = _MAX_BM
        mp = _round_up(batch, bm)
        x = jnp.pad(x, ((0, mp - batch), (0, 0)))   # pads only the tiny activations

    if hidden <= _FULLK_MAX_HIDDEN:
        # ---- Common path (all BERT configs): single-step K, no accumulator. ----
        # Two balanced N tiles when hidden/2 is lane-aligned (v7x megacore splits
        # the W stream); otherwise one full-hidden tile (fewest grid steps).
        bn = hidden // 2 if (hidden % 256 == 0) else hidden
        grid = (mp // bm, hidden // bn)

        out = pl.pallas_call(
            _pooler_kernel_fullk,
            out_shape=jax.ShapeDtypeStruct((mp, hidden), out_dtype),
            grid_spec=pltpu.PrefetchScalarGridSpec(
                num_scalar_prefetch=0,
                grid=grid,
                in_specs=[
                    pl.BlockSpec((bm, hidden), lambda i, j: (i, 0)),  # x, resident over j
                    pl.BlockSpec((bn, hidden), lambda i, j: (j, 0)),  # W, native layout
                    pl.BlockSpec((1, bn), lambda i, j: (0, j)),       # bias
                ],
                out_specs=pl.BlockSpec((bm, bn), lambda i, j: (i, j)),
            ),
            compiler_params=pltpu.CompilerParams(
                dimension_semantics=("parallel", "parallel"),
                # Largest common-path tiles (< ~25 MiB double-buffered) fit with
                # headroom; 48 MiB stays under v7x's 64 MiB physical VMEM per TC.
                vmem_limit_bytes=48 * 1024 * 1024,
            ),
        )(x, weight, b2)
    else:
        # ---- Fallback for very large hidden: K-tiled accumulation. ----
        def _pick(dim):
            for c in (512, 256, 128):
                if dim % c == 0:
                    return c
            return 128
        bn = bk = _pick(hidden)
        kp = _round_up(hidden, bk)
        np_ = _round_up(hidden, bn)
        w = weight
        if kp != hidden:
            x = jnp.pad(x, ((0, 0), (0, kp - hidden)))
        if (np_, kp) != (hidden, hidden):
            # Rare (hidden > 2048 and not a multiple of 128); costs one extra W pass.
            w = jnp.pad(w, ((0, np_ - hidden), (0, kp - hidden)))
        if np_ != hidden:
            b2 = jnp.pad(b2, ((0, 0), (0, np_ - hidden)))
        grid = (mp // bm, np_ // bn, kp // bk)

        out = pl.pallas_call(
            functools.partial(_pooler_kernel_tiledk, bk=bk),
            out_shape=jax.ShapeDtypeStruct((mp, np_), out_dtype),
            grid_spec=pltpu.PrefetchScalarGridSpec(
                num_scalar_prefetch=0,
                grid=grid,
                in_specs=[
                    pl.BlockSpec((bm, kp), lambda i, j, k: (i, 0)),   # x K-resident
                    pl.BlockSpec((bn, bk), lambda i, j, k: (j, k)),   # W tile, native layout
                    pl.BlockSpec((1, bn), lambda i, j, k: (0, j)),    # bias
                ],
                out_specs=pl.BlockSpec((bm, bn), lambda i, j, k: (i, j)),
                scratch_shapes=[pltpu.VMEM((bm, bn), jnp.float32)],
            ),
            compiler_params=pltpu.CompilerParams(
                dimension_semantics=("parallel", "parallel", "arbitrary"),
                vmem_limit_bytes=48 * 1024 * 1024,
            ),
        )(x, w, b2)

    return out[:batch, :hidden]


if __name__ == "__main__":
    key = jax.random.PRNGKey(0)
    k_h, k_w, k_b = jax.random.split(key, 3)

    batch, seq, hidden = 2, 8, 32

    hidden_states = jax.random.normal(k_h, (batch, seq, hidden), dtype=jnp.float32)

    # nn.Linear default init: U(-1/sqrt(in_features), 1/sqrt(in_features))
    bound = 1.0 / (hidden ** 0.5)
    weight = jax.random.uniform(k_w, (hidden, hidden), jnp.float32, -bound, bound)
    bias = jax.random.uniform(k_b, (hidden,), jnp.float32, -bound, bound)

    out = bert_pooler_forward(hidden_states, weight, bias)
    jax.block_until_ready(out)

    # Pure-JAX reference (same math as the PyTorch module).
    ref = jnp.tanh(hidden_states[:, 0, :] @ weight.T + bias)
    assert out.shape == (batch, hidden), out.shape
    assert jnp.allclose(out, ref, atol=1e-5, rtol=1e-5), "mismatch vs reference"

    print("KERNEL_OK")
</pallas_src>

<mosaic_0001>
module attributes {stable_mosaic.version = 11 : i64} {
  func.func @_pooler_kernel_fullk(%arg0: i32, %arg1: i32, %arg2: memref<2x32xf32, #tpu.memory_space<vmem>>, %arg3: memref<32x32xf32, #tpu.memory_space<vmem>>, %arg4: memref<1x32xf32, #tpu.memory_space<vmem>>, %arg5: memref<2x32xf32, #tpu.memory_space<vmem>>) attributes {dimension_semantics = [#tpu.dimension_semantics<parallel>, #tpu.dimension_semantics<parallel>], iteration_bounds = array<i64: 1, 1>, scalar_prefetch = 0 : i64, scratch_operands = 0 : i64, tpu.core_type = #tpu.core_type<tc>, window_params = [{transform_indices = @transform_0, window_bounds = array<i64: 2, 32>}, {transform_indices = @transform_1, window_bounds = array<i64: 32, 32>}, {transform_indices = @transform_2, window_bounds = array<i64: 1, 32>}, {transform_indices = @transform_3, window_bounds = array<i64: 2, 32>}]} {
    %c0 = arith.constant 0 : index
    %c0_0 = arith.constant 0 : index
    %0 = vector.load %arg2[%c0, %c0_0] : memref<2x32xf32, #tpu.memory_space<vmem>>, vector<2x32xf32>
    %c0_1 = arith.constant 0 : index
    %c0_2 = arith.constant 0 : index
    %1 = vector.load %arg3[%c0_1, %c0_2] : memref<32x32xf32, #tpu.memory_space<vmem>>, vector<32x32xf32>
    %cst = arith.constant dense<0.000000e+00> : vector<2x32xf32>
    %2 = tpu.matmul %0, %1, %cst {dimension_numbers = #tpu.dot_dimension_numbers<[1], [1], [0], [0], [0, 0, 1, 0], [], []>} : vector<2x32xf32>, vector<32x32xf32>, vector<2x32xf32> -> vector<2x32xf32>
    %c0_3 = arith.constant 0 : index
    %c0_4 = arith.constant 0 : index
    %3 = vector.load %arg4[%c0_3, %c0_4] : memref<1x32xf32, #tpu.memory_space<vmem>>, vector<1x32xf32>
    %4 = vector.broadcast %3 : vector<1x32xf32> to vector<2x32xf32>
    %5 = arith.addf %2, %4 : vector<2x32xf32>
    %6 = math.tanh %5 : vector<2x32xf32>
    %c0_5 = arith.constant 0 : index
    %c0_6 = arith.constant 0 : index
    %7 = vector.load %arg5[%c0_5, %c0_6] : memref<2x32xf32, #tpu.memory_space<vmem>>, vector<2x32xf32>
    tpu.vector_store %arg5[%c0_5, %c0_6], %6 {strides = array<i32>} : memref<2x32xf32, #tpu.memory_space<vmem>>, vector<2x32xf32>,
    return
  }
  func.func @transform_0(%arg0: i32, %arg1: i32) -> (i32, i32) {
    %c0_i32 = arith.constant 0 : i32
    %c0_i32_0 = arith.constant 0 : i32
    return %arg0, %c0_i32 : i32, i32
  }
  func.func @transform_1(%arg0: i32, %arg1: i32) -> (i32, i32) {
    %c0_i32 = arith.constant 0 : i32
    %c0_i32_0 = arith.constant 0 : i32
    return %arg1, %c0_i32 : i32, i32
  }
  func.func @transform_2(%arg0: i32, %arg1: i32) -> (i32, i32) {
    %c0_i32 = arith.constant 0 : i32
    %c0_i32_0 = arith.constant 0 : i32
    return %c0_i32, %arg1 : i32, i32
  }
  func.func @transform_3(%arg0: i32, %arg1: i32) -> (i32, i32) {
    %c0_i32 = arith.constant 0 : i32
    return %arg0, %arg1 : i32, i32
  }
}

</mosaic_0001>

<bundles_post_ra>
// kernel: bert_pooler_forward.1
= control target key start
LH: loop header
LB: loop body
LE: loop exit
PB: predicated region body
PF: predicated region fallthrough
CT: control target
= control target key end

     0   :  { %8 = vsyncpa [#allocation3], 0  ;;  %s289_s0 = inlined_call_operand.vmem [shape: f32[2,32], index: 0, kind: input, shape index: {}]   ;;  %s290_s1 = inlined_call_operand.hbm [shape: f32[32,32], index: 1, kind: input, shape index: {}]   ;;  %s291_s2 = inlined_call_operand.vmem [shape: f32[1,32], index: 2, kind: input, shape index: {}]   ;;  %s292_s3 = inlined_call_operand.hbm [shape: f32[2,32], index: 3, kind: output, shape index: {}]  }
   0x1   :  { %9 = vsyncpa [#allocation4], 0  ;;  %s232_s12 = smov [#allocation2]   ;;  %s184_s16 = scalar_lea.hbm %s290_s1, 512 }
   0x2   :  { %s17_s13 = sshll.u32 %s232_s12, 4  ;;  %p185_p0 = scmp.ne.s32.totalorder %s290_s1, %s184_s16  ;;  %s18_s13 = int_to_ptr.vmem [resolvable:$true] %s17_s13 }
   0x3   :  { %p188_p1 = scmp.lt.u32.totalorder %s184_s16, %s290_s1 }
   0x5   :  { %p190_p2 = pnand %p188_p1, %p185_p0 }
   0x7   :  { %193 = shalt.err (!%p190_p2)
}
   0x8   :  { %s194_s21 = scalar_lea.vmem %s18_s13, 512  ;;  %p199_p4 = scmp.lt.s32.totalorder %s18_s13, %s18_s13 }
   0x9   :  { %p195_p3 = scmp.ne.s32.totalorder %s18_s13, %s194_s21  ;;  %p200_p5 = scmp.lt.s32.totalorder %s194_s21, %s194_s21 }
   0xb   :  { %p201_p6 = por %p200_p5, %p199_p4 }
   0xd   :  { %p202_p7 = pnand %p201_p6, %p195_p3 }
   0xf   :  { %205 = shalt.err (!%p202_p7)
}
  0x10   :  { %s233_s22 = smov 128   ;;  %s234_s23 = smov 8  }
  0x11   :  { %23 = dma.hbm_to_vmem [thread:$0]  %s290_s1, 512, %s18_s13, [#allocation3], %s233_s22, %s233_s22, %s234_s23  }
  0x12   :  { %228 = dma.done.wait [#allocation3], 512  }
  0x13   :  { %229 = vsyncadd [#allocation3], 4294966784  ;;  %v235_v0 = vmov 0.0|0.0   ;;  %vm236_vm0 = vmmov 0   ;;  %v237_v1 = vmov 0.0   ;;  %vm41_vm1 = vcmask 261120  }
  0x14   :  { %167 = vmatprep.subr.bf16.mxu0 %v235_v0  ;;  %164 = vmatprep.mubr.msk.f32.mxu0 %vm236_vm0, %v237_v1  ;;  %v30_v2 = vld [vmem:[#allocation2] sm:$0xff]  ;;  %v31_v3 = vld [vmem:[#allocation2 + $0x8] sm:$0xff]  ;;  %vm169_vm2 = vmpackc.low %vm41_vm1, %vm41_vm1  ;;  %s238_s29 = smov [#allocation5]   ;;  %vm128_vm3 = vcmask 254976  }
  0x15   :  { %v168_v4 = vpack.c.bf16 %v31_v3, %v30_v2  ;;  %v32_v5 = vld [vmem:[#allocation2 + $0x10] sm:$0xff]  ;;  %v33_v6 = vld [vmem:[#allocation2 + $0x18] sm:$0xff]  ;;  %v29_v8 = vld [vmem:[%s289_s0] sm:$0x3]  ;;  %s136_s30 = sshll.u32 %s238_s29, 4  ;;  %s137_s30 = int_to_ptr.vmem [resolvable:$true] %s136_s30 }
  0x16   :  { %v172_v7 = vpack.c.bf16 %v33_v6, %v32_v5  ;;  %v145_v9 = vld [vmem:[%s291_s2] ss:$0 sm:$0xff]  ;;  %s206_s4 = scalar_lea.vmem %s137_s30, 32  ;;  %p211_p9 = scmp.lt.s32.totalorder %s137_s30, %s137_s30 }
  0x17   :  { %170 = vmatpush3.bf16.xpose.msk.msra.mxu0 %vm169_vm2, %v168_v4  ;;  %p207_p8 = scmp.ne.s32.totalorder %s137_s30, %s206_s4  ;;  %p212_p10 = scmp.lt.s32.totalorder %s206_s4, %s206_s4 }
  0x18   :  { %171 = vmatprep.subr.bf16.mxu0 %v235_v0 }
  0x19   :  { %p213_p11 = por %p212_p10, %p211_p9 }
  0x1b   :  { %p214_p12 = pnand %p213_p11, %p207_p8 }
  0x1f   :  { %174 = vmatpush3.bf16.xpose.msk.msra.mxu0 %vm169_vm2, %v172_v7 }
  0x26   :  { %165 = vmatmul.mubr.msk.f32.vlgmr.msra.gmra.mrb[0].mxu0 %vm41_vm1, %v29_v8 }
  0xf9   :  { %v123_v10 = vpop.f32.mrb[0].mxu0 }
  0xfa   :  { %v124_v11 = vadd.f32 %v145_v9, %v123_v10  ;;  %v166_v12 = vpop.f32.mrb[1].mxu0 }
  0xfc   :  { %182 = vtanh.f32 %v124_v11 }
 0x106   :  { %v183_v13 = vpop.eup %182 }
 0x107   :  { %129 = vst.msk [vmem:[#allocation5] sm:$0x3] %vm128_vm3, %v183_v13 }
 0x108   :  { %217 = shalt.err (!%p214_p12)
}
 0x109   :  { %s218_s2 = scalar_lea.hbm %s292_s3, 32 }
 0x10a   :  { %p219_p13 = scmp.ne.s32.totalorder %s292_s3, %s218_s2  ;;  %p222_p0 = scmp.lt.u32.totalorder %s218_s2, %s292_s3 }
 0x10c   :  { %p224_p1 = pnand %p222_p0, %p219_p13 }
 0x10e   :  { %227 = shalt.err (!%p224_p1)
}
 0x10f   :  { %139 = dma.vmem_to_hbm [thread:$0]  %s137_s30, 32, %s292_s3, [#allocation4]  }
 0x110   :  { %230 = dma.done.wait [#allocation4], 32  }
 0x111   :  { %231 = vsyncadd [#allocation4], 4294967264 }
 0x112   :  { %143 = vsyncpa [#allocation3], 1 }
 0x113   :  { %144 = vsyncpa [#allocation4], 1 }

</bundles_post_ra>
